<compile_context>
chip_gen: v7x
topology: tpu7x:2x2x1
jax: 0.10.0
libtpu: 0.0.40
codegen_flags: <defaults>
</compile_context>

<pallas_src>
import numpy as np
import jax
import jax.numpy as jnp
from jax.experimental import pallas as pl
from jax.experimental.pallas import tpu as pltpu

MAX_LOGIT_SCALE = 100.0
TARGET_BLOCK_BYTES = 4 * 1024 * 1024   # ~4 MiB per block
VMEM_LIMIT_BYTES = 32 * 1024 * 1024    # footprint (2 streams x 2 bufs x 4 MiB) << limit


def _logit_scaling_kernel(scale_ref, x_ref, o_ref):
    # scale_ref: (1,) f32 in SMEM holding log_logit_scale.
    # x_ref / o_ref: (block_rows, block_cols) tiles in VMEM.
    # exp/min re-run per grid step but live on EUP/VPU slots that are idle in a
    # memory-bound kernel, so keeping them in-kernel is free (and avoids a
    # separate, un-hidden XLA op in the wrapper).
    scale = jnp.minimum(
        jnp.exp(jnp.full((1, 1), scale_ref[0], dtype=jnp.float32)),
        jnp.float32(MAX_LOGIT_SCALE),
    )
    o_ref[...] = (x_ref[...].astype(jnp.float32) * scale).astype(o_ref.dtype)


def _round_up(n, m):
    return ((n + m - 1) // m) * m


def _sublane_pack(dtype):
    itemsize = jnp.dtype(dtype).itemsize
    return max(8, (4 // max(itemsize, 1)) * 8)   # f32 -> 8, bf16 -> 16, int8/fp8 -> 32


def _pick_lanes(total):
    for lanes in (1024, 512, 256, 128):
        if total % lanes == 0:
            return lanes
    return None


def _pick_block_rows(rows, row_bytes, pack):
    """Row-tile size: ~TARGET_BLOCK_BYTES per block, a multiple of the sublane
    packing (or the full extent), and >= 2 grid steps when possible so both
    v7x TensorCores get work."""
    if rows <= pack:
        return rows                               # full extent (exempt from /8 rule)
    max_by_bytes = max(pack, (TARGET_BLOCK_BYTES // row_bytes) // pack * pack)
    block_rows = min(max_by_bytes, rows)
    if rows <= 2 * max_by_bytes:
        half = _round_up(-(-rows // 2), pack)     # ceil(rows/2) rounded to packing
        if half < rows:
            block_rows = half                     # >= 2 grid steps (megacore)
    return block_rows


def _pallas_scale(x2d, scale_arr, block_shape, out_dtype, in_place):
    rows, cols = x2d.shape
    block_rows, block_cols = block_shape
    grid = (pl.cdiv(rows, block_rows),)
    extra = {}
    if in_place and x2d.dtype == jnp.dtype(out_dtype):
        extra["input_output_aliases"] = {1: 0}    # write result over x's buffer
    return pl.pallas_call(
        _logit_scaling_kernel,
        out_shape=jax.ShapeDtypeStruct((rows, cols), out_dtype),
        grid=grid,
        in_specs=[
            pl.BlockSpec(memory_space=pltpu.SMEM),                      # log_logit_scale
            pl.BlockSpec((block_rows, block_cols), lambda i: (i, 0)),   # row tile of x
        ],
        out_specs=pl.BlockSpec((block_rows, block_cols), lambda i: (i, 0)),
        compiler_params=pltpu.CompilerParams(
            dimension_semantics=("parallel",),
            vmem_limit_bytes=VMEM_LIMIT_BYTES,
        ),
        **extra,
    )(scale_arr, x2d)


def learnable_logit_scaling(x, log_logit_scale, *, out_dtype=None, donate_x=False):
    """clip(exp(log_logit_scale), max=100) * x via a Pallas TPU kernel.

    Matches PyTorch type promotion by default (f32 parameter * bf16 x -> f32
    result); pass out_dtype=x.dtype to keep the input dtype instead.
    """
    orig_shape = x.shape
    if out_dtype is None:
        out_dtype = jnp.promote_types(x.dtype, jnp.float32)
    scale_arr = jnp.asarray(log_logit_scale, jnp.float32).reshape(1)

    total = int(np.prod(orig_shape)) if x.ndim > 0 else 1
    itemsize = jnp.dtype(x.dtype).itemsize
    pack = _sublane_pack(x.dtype)

    lanes = _pick_lanes(total)
    if lanes is not None:
        # Fast path: element count divisible by 128 -> lane-dense slab, no pad,
        # no tail copy (exactly one HBM read + one write).
        rows = total // lanes
        x2d = x.reshape(rows, lanes)
        block_rows = _pick_block_rows(rows, lanes * itemsize, pack)
        out2d = _pallas_scale(x2d, scale_arr, (block_rows, lanes), out_dtype, donate_x)
        return out2d.reshape(orig_shape)

    if x.ndim >= 2:
        # Ragged last dim: use the full last dim as the block's minor dim
        # (full-dim blocks are exempt from the 128-divisibility rule) and tile
        # the collapsed leading dims.  Stores may be partially masked but
        # there is still exactly one HBM pass each way.
        rows = int(np.prod(orig_shape[:-1]))
        cols = int(orig_shape[-1])
        x2d = x.reshape(rows, cols)
        block_rows = _pick_block_rows(rows, cols * itemsize, pack)
        out2d = _pallas_scale(x2d, scale_arr, (block_rows, cols), out_dtype, donate_x)
        return out2d.reshape(orig_shape)

    # 0-D / ragged 1-D fallback: single full-extent block.
    # TODO(synk): tile very large ragged 1-D inputs instead of one VMEM block.
    x2d = x.reshape(1, max(total, 1))
    out2d = _pallas_scale(x2d, scale_arr, x2d.shape, out_dtype, donate_x)
    return out2d.reshape(orig_shape)


if __name__ == "__main__":
    # Deterministic parameter init, matching the module's __init__:
    #   log_logit_scale = log(1 / 0.07)   (scalar)
    logit_scale_init = 1.0 / 0.07
    log_logit_scale = jnp.asarray(np.log(logit_scale_init), jnp.float32)
    scale_val = jnp.minimum(jnp.exp(log_logit_scale), MAX_LOGIT_SCALE)  # reference scale

    key = jax.random.PRNGKey(0)
    k1, k2, k3, k4 = jax.random.split(key, 4)

    # Case 1: embedding-like f32 tensor (batch=2, seq=8, hidden=32), 128-aligned.
    x1 = jax.random.normal(k1, (2, 8, 32), dtype=jnp.float32)
    out1 = jax.block_until_ready(learnable_logit_scaling(x1, log_logit_scale))
    np.testing.assert_allclose(np.asarray(out1), np.asarray(scale_val * x1),
                               rtol=1e-6, atol=1e-6)

    # Case 2: bf16 input -> f32 output (PyTorch type promotion), 1024-aligned.
    x2 = jax.random.normal(k2, (2, 8, 64), dtype=jnp.bfloat16)
    out2 = jax.block_until_ready(learnable_logit_scaling(x2, log_logit_scale))
    assert out2.dtype == jnp.float32
    ref2 = scale_val * x2.astype(jnp.float32)
    np.testing.assert_allclose(np.asarray(out2), np.asarray(ref2),
                               rtol=1e-6, atol=1e-6)

    # Case 3: ragged last dim (not a multiple of 128) -> full-dim-block fallback.
    x3 = jax.random.normal(k3, (2, 5, 33), dtype=jnp.float32)
    out3 = jax.block_until_ready(learnable_logit_scaling(x3, log_logit_scale))
    np.testing.assert_allclose(np.asarray(out3), np.asarray(scale_val * x3),
                               rtol=1e-6, atol=1e-6)

    # Case 4: larger aligned tensor -> exercises the >=2-step grid / row tiling.
    x4 = jax.random.normal(k4, (4, 64, 128), dtype=jnp.float32)
    out4 = jax.block_until_ready(learnable_logit_scaling(x4, log_logit_scale))
    np.testing.assert_allclose(np.asarray(out4), np.asarray(scale_val * x4),
                               rtol=1e-6, atol=1e-6)

    print("KERNEL_OK")
</pallas_src>

<mosaic_0001>
module attributes {stable_mosaic.version = 11 : i64} {
  func.func @_logit_scaling_kernel(%arg0: i32, %arg1: memref<1xf32, #tpu.memory_space<smem>>, %arg2: memref<1x512xf32, #tpu.memory_space<vmem>>, %arg3: memref<1x512xf32, #tpu.memory_space<vmem>>) attributes {dimension_semantics = [#tpu.dimension_semantics<parallel>], iteration_bounds = array<i64: 1>, scalar_prefetch = 0 : i64, scratch_operands = 0 : i64, tpu.core_type = #tpu.core_type<tc>, window_params = [{transform_indices = @transform_0, window_bounds = array<i64: 1>}, {transform_indices = @transform_1, window_bounds = array<i64: 1, 512>}, {transform_indices = @transform_2, window_bounds = array<i64: 1, 512>}]} {
    %c0 = arith.constant 0 : index
    %0 = memref.load %arg1[%c0] : memref<1xf32, #tpu.memory_space<smem>>
    %1 = vector.broadcast %0 : f32 to vector<1x1xf32>
    %2 = math.exp %1 : vector<1x1xf32>
    %cst = arith.constant 1.000000e+02 : f32
    %3 = vector.broadcast %cst : f32 to vector<1x1xf32>
    %4 = arith.minimumf %2, %3 : vector<1x1xf32>
    %c0_0 = arith.constant 0 : index
    %c0_1 = arith.constant 0 : index
    %5 = vector.load %arg2[%c0_0, %c0_1] : memref<1x512xf32, #tpu.memory_space<vmem>>, vector<1x512xf32>
    %6 = vector.broadcast %4 : vector<1x1xf32> to vector<1x512xf32>
    %7 = arith.mulf %5, %6 : vector<1x512xf32>
    %c0_2 = arith.constant 0 : index
    %c0_3 = arith.constant 0 : index
    %8 = vector.load %arg3[%c0_2, %c0_3] : memref<1x512xf32, #tpu.memory_space<vmem>>, vector<1x512xf32>
    tpu.vector_store %arg3[%c0_2, %c0_3], %7 {strides = array<i32>} : memref<1x512xf32, #tpu.memory_space<vmem>>, vector<1x512xf32>,
    return
  }
  func.func @transform_0(%arg0: i32) -> i32 {
    %c0_i32 = arith.constant 0 : i32
    %c0_i32_0 = arith.constant 0 : i32
    return %c0_i32 : i32
  }
  func.func @transform_1(%arg0: i32) -> (i32, i32) {
    %c0_i32 = arith.constant 0 : i32
    %c0_i32_0 = arith.constant 0 : i32
    return %arg0, %c0_i32 : i32, i32
  }
  func.func @transform_2(%arg0: i32) -> (i32, i32) {
    %c0_i32 = arith.constant 0 : i32
    %c0_i32_0 = arith.constant 0 : i32
    return %arg0, %c0_i32 : i32, i32
  }
}

</mosaic_0001>

<bundles_post_ra>
// kernel: tpu_custom_call.1
= control target key start
LH: loop header
LB: loop body
LE: loop exit
PB: predicated region body
PF: predicated region fallthrough
CT: control target
= control target key end

     0   :  { %8 = vsyncpa [#allocation4], 0  ;;  %s148_s0 = inlined_call_operand.<no memory space> [shape: f32[1], index: 0, kind: input, shape index: {}]   ;;  %s149_s1 = inlined_call_operand.hbm [shape: f32[1,512], index: 1, kind: input, shape index: {}]   ;;  %s150_s2 = inlined_call_operand.hbm [shape: f32[1,512], index: 2, kind: output, shape index: {}]  }
   0x1   :  { %9 = vsyncpa [#allocation5], 0  ;;  %s104_s9 = smov [#allocation3]   ;;  %s56_s13 = scalar_lea.hbm %s149_s1, 64 }
   0x2   :  { %s18_s10 = sshll.u32 %s104_s9, 4  ;;  %p57_p0 = scmp.ne.s32.totalorder %s149_s1, %s56_s13  ;;  %s19_s10 = int_to_ptr.vmem [resolvable:$true] %s18_s10 }
   0x3   :  { %p60_p1 = scmp.lt.u32.totalorder %s56_s13, %s149_s1 }
   0x5   :  { %p62_p2 = pnand %p60_p1, %p57_p0 }
   0x7   :  { %65 = shalt.err (!%p62_p2)
}
   0x8   :  { %s66_s18 = scalar_lea.vmem %s19_s10, 64  ;;  %p71_p4 = scmp.lt.s32.totalorder %s19_s10, %s19_s10 }
   0x9   :  { %p67_p3 = scmp.ne.s32.totalorder %s19_s10, %s66_s18  ;;  %p72_p5 = scmp.lt.s32.totalorder %s66_s18, %s66_s18 }
   0xb   :  { %p73_p6 = por %p72_p5, %p71_p4 }
   0xd   :  { %p74_p7 = pnand %p73_p6, %p67_p3 }
   0xf   :  { %77 = shalt.err (!%p74_p7)
}
  0x10   :  { %21 = dma.hbm_to_vmem [thread:$0]  %s149_s1, 64, %s19_s10, [#allocation4]  }
  0x11   :  { %100 = dma.done.wait [#allocation4], 64  }
  0x12   :  { %101 = vsyncadd [#allocation4], 4294967232  ;;  %v26_v0 = vstv %s148_s0  ;;  %v32_v2 = vlaneseq  ;;  %v30_v4 = vld [vmem:[#allocation3] sm:$0xf]  ;;  %s105_s23 = smov [#allocation6]  }
  0x13   :  { %v27_v1 = vmul.f32 1.442695, %v26_v0  ;;  %s43_s24 = sshll.u32 %s105_s23, 4  ;;  %s44_s24 = int_to_ptr.vmem [resolvable:$true] %s43_s24 }
  0x14   :  { %vm34_vm0 = vcmp.lt.s32.totalorder %v32_v2, 512  ;;  %s78_s25 = scalar_lea.vmem %s44_s24, 64  ;;  %p83_p9 = scmp.lt.s32.totalorder %s44_s24, %s44_s24 }
  0x15   :  { %54 = vpow2.f32 %v27_v1  ;;  %p79_p8 = scmp.ne.s32.totalorder %s44_s24, %s78_s25  ;;  %p84_p10 = scmp.lt.s32.totalorder %s78_s25, %s78_s25 }
  0x17   :  { %p85_p11 = por %p84_p10, %p83_p9 }
  0x19   :  { %p86_p12 = pnand %p85_p11, %p79_p8 }
  0x1f   :  { %v55_v3 = vpop.eup %54 }
  0x20   :  { %v29_v5 = vmin.f32 %v55_v3, 100.0 }
  0x22   :  { %v31_v6 = vmul.f32 %v30_v4, %v29_v5 }
  0x24   :  { %36 = vst.msk [vmem:[#allocation6] sm:$0xf] %vm34_vm0, %v31_v6 }
  0x25   :  { %89 = shalt.err (!%p86_p12)
}
  0x26   :  { %s90_s26 = scalar_lea.hbm %s150_s2, 64 }
  0x27   :  { %p91_p13 = scmp.ne.s32.totalorder %s150_s2, %s90_s26  ;;  %p94_p0 = scmp.lt.u32.totalorder %s90_s26, %s150_s2 }
  0x29   :  { %p96_p1 = pnand %p94_p0, %p91_p13 }
  0x2b   :  { %99 = shalt.err (!%p96_p1)
}
  0x2c   :  { %46 = dma.vmem_to_hbm [thread:$0]  %s44_s24, 64, %s150_s2, [#allocation5]  }
  0x2d   :  { %102 = dma.done.wait [#allocation5], 64  }
  0x2e   :  { %103 = vsyncadd [#allocation5], 4294967232 }
  0x2f   :  { %50 = vsyncpa [#allocation4], 1 }
  0x30   :  { %51 = vsyncpa [#allocation5], 1 }

</bundles_post_ra>
